<compile_context>
chip_gen: v7x
topology: tpu7x:2x2x1
jax: 0.10.0
libtpu: 0.0.40
codegen_flags: <defaults>
</compile_context>

<pallas_src>
import functools

import jax
import jax.numpy as jnp
from jax.experimental import pallas as pl
from jax.experimental.pallas import tpu as pltpu


_LANE = 128
_SUBLANE = 8
_TD_MAX = 2048                     # cap on the feature (contraction) block width
_X_BUF_BUDGET = 8 * 1024 * 1024    # bytes per x VMEM buffer (Pallas double-buffers it)


def _round_up(v, m):
    return (v + m - 1) // m * m


def _logreg_kernel(x_ref, w_ref, b_ref, o_ref, acc_ref, *, d_total, td):
    """One (batch-tile i, feature-tile k) step of  out = x @ W^T + b.

    x_ref  : (TB, TD) natural (batch, feature) tile of x, native dtype
    w_ref  : (8,  TD) weight row in sublane 0, zero rows 1..7 (aligned MXU M)
    b_ref  : (1,)     scalar bias in SMEM
    o_ref  : (1,  TB) lane-dense logits slab for this batch tile
    acc_ref: (8,  TB) f32 accumulator scratch (row 0 holds the real sums)
    """
    k = pl.program_id(1)
    nk = pl.num_programs(1)

    @pl.when(k == 0)
    def _init():
        acc_ref[...] = jnp.zeros_like(acc_ref)

    def accumulate(x_tile):
        # (8, TD) @ (TB, TD)^T -> (8, TB): the MXU performs the reduction
        # internally (no tile-sized elementwise temporary) and the result is
        # already lane-dense (batch on lanes).  Upcast only the tiny weight.
        w = w_ref[...].astype(x_tile.dtype)
        acc_ref[...] += jax.lax.dot_general(
            w, x_tile,
            dimension_numbers=(((1,), (1,)), ((), ())),
            preferred_element_type=jnp.float32,
            precision=jax.lax.Precision.HIGHEST,
        )

    if d_total % td != 0:
        # Ragged feature edge: only the last k block's buffer has garbage
        # columns beyond d_total; zero them before the dot so stale (possibly
        # NaN) VMEM contents cannot poison valid batch lanes.
        @pl.when(k < nk - 1)
        def _body():
            accumulate(x_ref[...])

        @pl.when(k == nk - 1)
        def _edge():
            col = jax.lax.broadcasted_iota(jnp.int32, x_ref.shape, 1)
            accumulate(jnp.where(col + k * td < d_total, x_ref[...], 0))
    else:
        accumulate(x_ref[...])

    @pl.when(k == nk - 1)
    def _store():
        # Row 0 of the accumulator is the real result; lane-dense (1, TB) store.
        o_ref[...] = (acc_ref[0:1, :] + b_ref[0]).astype(o_ref.dtype)


def _pick_tiles(batch, d, itemsize):
    """Choose (TB, TD) so each x buffer is ~_X_BUF_BUDGET bytes, TD is bounded,
    and there are >=2 batch tiles when the batch is big enough (v7x megacore)."""
    td = d if d <= _TD_MAX else _TD_MAX
    tb_cap = max(_LANE, (_X_BUF_BUDGET // (td * itemsize)) // _LANE * _LANE)
    if batch <= tb_cap:
        if batch >= 2 * _LANE:
            tb = _round_up(pl.cdiv(batch, 2), _LANE)   # >=2 tiles for 2 TCs
        else:
            tb = batch                                 # tiny batch: one exact tile
    else:
        nt = pl.cdiv(batch, tb_cap)
        tb = min(_round_up(pl.cdiv(batch, nt), _LANE), tb_cap)  # balanced tiles
    return tb, td


def logistic_regression_forward(x, weight, bias):
    """out = x @ weight^T + bias (raw logits), matching nn.Linear(input_dim, 1)."""
    batch, d = x.shape
    itemsize = jnp.dtype(x.dtype).itemsize

    tb, td = _pick_tiles(batch, d, itemsize)
    nb = pl.cdiv(batch, tb)
    nk = pl.cdiv(d, td)
    d_pad = nk * td

    # Tiny (8, d_pad) weight operand: real weights in row 0, zeros elsewhere
    # (aligned MXU M, and zero feature padding so ragged-D terms vanish).
    # Padding/reshaping this costs nothing compared to touching x.
    w_row = jnp.reshape(weight, (1, d)).astype(jnp.float32)
    w8 = jnp.zeros((_SUBLANE, d_pad), jnp.float32).at[0:1, :d].set(w_row)
    b = jnp.reshape(bias, (1,)).astype(jnp.float32)

    kernel = functools.partial(_logreg_kernel, d_total=d, td=td)

    # VMEM budget: 2 x-tile buffers (double-buffered) + small w / out / acc.
    vmem_need = (2 * tb * td * itemsize
                 + 2 * _SUBLANE * td * 4
                 + 3 * _SUBLANE * _round_up(tb, _LANE) * 4)
    vmem_limit = int(max(vmem_need + (4 << 20), 24 << 20))

    out_row = pl.pallas_call(
        kernel,
        out_shape=jax.ShapeDtypeStruct((1, batch), jnp.float32),
        grid=(nb, nk),
        in_specs=[
            pl.BlockSpec((tb, td), lambda i, k: (i, k)),          # x, natural layout
            pl.BlockSpec((_SUBLANE, td), lambda i, k: (0, k)),    # weight block
            pl.BlockSpec(memory_space=pltpu.MemorySpace.SMEM),    # scalar bias
        ],
        out_specs=pl.BlockSpec((1, tb), lambda i, k: (0, i)),
        scratch_shapes=[pltpu.VMEM((_SUBLANE, tb), jnp.float32)],
        compiler_params=pltpu.CompilerParams(
            dimension_semantics=("parallel", "arbitrary"),
            vmem_limit_bytes=vmem_limit,
        ),
    )(x, w8, b)

    # (1, batch) row -> (batch, 1) column; batch*4 bytes, negligible.
    return out_row.reshape(batch, 1)


if __name__ == "__main__":
    key = jax.random.PRNGKey(0)
    kx, kw, kb = jax.random.split(key, 3)

    batch, input_dim = 8, 32
    x = jax.random.normal(kx, (batch, input_dim), jnp.float32)

    # Deterministic init mimicking nn.Linear: U(-1/sqrt(fan_in), 1/sqrt(fan_in))
    bound = 1.0 / jnp.sqrt(jnp.float32(input_dim))
    weight = jax.random.uniform(kw, (input_dim,), jnp.float32, -bound, bound)
    bias = jax.random.uniform(kb, (1,), jnp.float32, -bound, bound)

    out = logistic_regression_forward(x, weight, bias)
    out = jax.block_until_ready(out)

    # Plain-JAX reference (raw logits, exactly what the PyTorch forward returns)
    ref = x @ weight.reshape(input_dim, 1) + bias
    assert out.shape == (batch, 1), out.shape
    assert jnp.allclose(out, ref, atol=1e-5, rtol=1e-5), float(jnp.max(jnp.abs(out - ref)))

    print("KERNEL_OK")
</pallas_src>

<mosaic_0001>
module attributes {stable_mosaic.version = 11 : i64} {
  func.func @_logreg_kernel(%arg0: i32, %arg1: i32, %arg2: memref<8x32xf32, #tpu.memory_space<vmem>>, %arg3: memref<8x32xf32, #tpu.memory_space<vmem>>, %arg4: memref<1xf32, #tpu.memory_space<smem>>, %arg5: memref<1x8xf32, #tpu.memory_space<vmem>>, %arg6: memref<8x8xf32, #tpu.memory_space<vmem>>) attributes {dimension_semantics = [#tpu.dimension_semantics<parallel>, #tpu.dimension_semantics<arbitrary>], iteration_bounds = array<i64: 1, 1>, scalar_prefetch = 0 : i64, scratch_operands = 1 : i64, tpu.core_type = #tpu.core_type<tc>, window_params = [{transform_indices = @transform_0, window_bounds = array<i64: 8, 32>}, {transform_indices = @transform_1, window_bounds = array<i64: 8, 32>}, {transform_indices = @transform_2, window_bounds = array<i64: 1>}, {transform_indices = @transform_3, window_bounds = array<i64: 1, 8>}]} {
    %c0_i32 = arith.constant 0 : i32
    %0 = arith.cmpi eq, %arg1, %c0_i32 : i32
    %1 = arith.extui %0 : i1 to i32
    %c0_i32_0 = arith.constant 0 : i32
    %2 = arith.cmpi ne, %1, %c0_i32_0 : i32
    scf.if %2 {
      %cst_10 = arith.constant 0.000000e+00 : f32
      %12 = vector.broadcast %cst_10 : f32 to vector<8x8xf32>
      %c0_11 = arith.constant 0 : index
      %c0_12 = arith.constant 0 : index
      %13 = vector.load %arg6[%c0_11, %c0_12] : memref<8x8xf32, #tpu.memory_space<vmem>>, vector<8x8xf32>
      tpu.vector_store %arg6[%c0_11, %c0_12], %12 {strides = array<i32>} : memref<8x8xf32, #tpu.memory_space<vmem>>, vector<8x8xf32>,
    } else {
    }
    %c0 = arith.constant 0 : index
    %c0_1 = arith.constant 0 : index
    %3 = vector.load %arg2[%c0, %c0_1] : memref<8x32xf32, #tpu.memory_space<vmem>>, vector<8x32xf32>
    %c0_2 = arith.constant 0 : index
    %c0_3 = arith.constant 0 : index
    %4 = vector.load %arg3[%c0_2, %c0_3] : memref<8x32xf32, #tpu.memory_space<vmem>>, vector<8x32xf32>
    %c0_4 = arith.constant 0 : index
    %c0_5 = arith.constant 0 : index
    %5 = vector.load %arg6[%c0_4, %c0_5] : memref<8x8xf32, #tpu.memory_space<vmem>>, vector<8x8xf32>
    %cst = arith.constant dense<0.000000e+00> : vector<8x8xf32>
    %6 = tpu.matmul %4, %3, %cst {dimension_numbers = #tpu.dot_dimension_numbers<[1], [1], [0], [0], [0, 0, 1, 0], [], []>, precision = #tpu.contract_precision<fp32>} : vector<8x32xf32>, vector<8x32xf32>, vector<8x8xf32> -> vector<8x8xf32>
    %7 = arith.addf %5, %6 : vector<8x8xf32>
    %c0_6 = arith.constant 0 : index
    %c0_7 = arith.constant 0 : index
    %8 = vector.load %arg6[%c0_6, %c0_7] : memref<8x8xf32, #tpu.memory_space<vmem>>, vector<8x8xf32>
    tpu.vector_store %arg6[%c0_6, %c0_7], %7 {strides = array<i32>} : memref<8x8xf32, #tpu.memory_space<vmem>>, vector<8x8xf32>,
    %c0_i32_8 = arith.constant 0 : i32
    %9 = arith.cmpi eq, %arg1, %c0_i32_8 : i32
    %10 = arith.extui %9 : i1 to i32
    %c0_i32_9 = arith.constant 0 : i32
    %11 = arith.cmpi ne, %10, %c0_i32_9 : i32
    scf.if %11 {
      %c0_10 = arith.constant 0 : index
      %c0_11 = arith.constant 0 : index
      %12 = vector.load %arg6[%c0_10, %c0_11] : memref<8x8xf32, #tpu.memory_space<vmem>>, vector<1x8xf32>
      %c0_12 = arith.constant 0 : index
      %13 = memref.load %arg4[%c0_12] : memref<1xf32, #tpu.memory_space<smem>>
      %14 = vector.broadcast %13 : f32 to vector<1x8xf32>
      %15 = arith.addf %12, %14 : vector<1x8xf32>
      %c0_13 = arith.constant 0 : index
      %c0_14 = arith.constant 0 : index
      %16 = vector.load %arg5[%c0_13, %c0_14] : memref<1x8xf32, #tpu.memory_space<vmem>>, vector<1x8xf32>
      tpu.vector_store %arg5[%c0_13, %c0_14], %15 {strides = array<i32>} : memref<1x8xf32, #tpu.memory_space<vmem>>, vector<1x8xf32>,
    } else {
    }
    return
  }
  func.func @transform_0(%arg0: i32, %arg1: i32) -> (i32, i32) {
    %c0_i32 = arith.constant 0 : i32
    return %arg0, %arg1 : i32, i32
  }
  func.func @transform_1(%arg0: i32, %arg1: i32) -> (i32, i32) {
    %c0_i32 = arith.constant 0 : i32
    %c0_i32_0 = arith.constant 0 : i32
    return %c0_i32, %arg1 : i32, i32
  }
  func.func @transform_2(%arg0: i32, %arg1: i32) -> i32 {
    %c0_i32 = arith.constant 0 : i32
    %c0_i32_0 = arith.constant 0 : i32
    return %c0_i32 : i32
  }
  func.func @transform_3(%arg0: i32, %arg1: i32) -> (i32, i32) {
    %c0_i32 = arith.constant 0 : i32
    %c0_i32_0 = arith.constant 0 : i32
    return %c0_i32, %arg0 : i32, i32
  }
}

</mosaic_0001>

<bundles_post_ra>
// kernel: tpu_custom_call.1
= control target key start
LH: loop header
LB: loop body
LE: loop exit
PB: predicated region body
PF: predicated region fallthrough
CT: control target
= control target key end

     0   :  { %9 = vsyncpa [#allocation5], 0  ;;  %s721_s0 = inlined_call_operand.hbm [shape: f32[8,32], index: 0, kind: input, shape index: {}]   ;;  %s722_s1 = inlined_call_operand.hbm [shape: f32[8,32], index: 1, kind: input, shape index: {}]   ;;  %s723_s2 = inlined_call_operand.<no memory space> [shape: f32[1], index: 2, kind: input, shape index: {}]   ;;  %s724_s3 = inlined_call_operand.hbm [shape: f32[1,8], index: 3, kind: output, shape index: {}]  }
   0x1   :  { %10 = vsyncpa [#allocation8], 0 }
   0x2   :  { %11 = vsyncpa [#allocation6], 0  ;;  %s649_s12 = smov [#allocation4]   ;;  %s650_s14 = smov [#allocation7]  }
   0x3   :  { %s18_s13 = sshll.u32 %s649_s12, 4  ;;  %s28_s15 = sshll.u32 %s650_s14, 4  ;;  %s19_s13 = int_to_ptr.vmem [resolvable:$true] %s18_s13  ;;  %s29_s15 = int_to_ptr.vmem [resolvable:$true] %s28_s15 }
   0x4   :  { %s577_s18 = scalar_lea.hbm %s721_s0, 128 }
   0x5   :  { %p578_p0 = scmp.ne.s32.totalorder %s721_s0, %s577_s18  ;;  %p581_p1 = scmp.lt.u32.totalorder %s577_s18, %s721_s0 }
   0x7   :  { %p583_p2 = pnand %p581_p1, %p578_p0 }
   0x9   :  { %586 = shalt.err (!%p583_p2)
}
   0xa   :  { %s587_s23 = scalar_lea.vmem %s19_s13, 128  ;;  %p592_p4 = scmp.lt.s32.totalorder %s19_s13, %s19_s13 }
   0xb   :  { %p588_p3 = scmp.ne.s32.totalorder %s19_s13, %s587_s23  ;;  %p593_p5 = scmp.lt.s32.totalorder %s587_s23, %s587_s23 }
   0xd   :  { %p594_p6 = por %p593_p5, %p592_p4 }
   0xf   :  { %p595_p7 = pnand %p594_p6, %p588_p3 }
  0x11   :  { %598 = shalt.err (!%p595_p7)
}
  0x12   :  { %21 = dma.hbm_to_vmem [thread:$0]  %s721_s0, 128, %s19_s13, [#allocation5]  }
  0x13   :  { %s599_s28 = scalar_lea.hbm %s722_s1, 128 }
  0x14   :  { %p600_p8 = scmp.ne.s32.totalorder %s722_s1, %s599_s28  ;;  %p603_p9 = scmp.lt.u32.totalorder %s599_s28, %s722_s1 }
  0x16   :  { %p605_p10 = pnand %p603_p9, %p600_p8 }
  0x18   :  { %608 = shalt.err (!%p605_p10)
}
  0x19   :  { %s609_s6 = scalar_lea.vmem %s29_s15, 128  ;;  %p614_p12 = scmp.lt.s32.totalorder %s29_s15, %s29_s15 }
  0x1a   :  { %p610_p11 = scmp.ne.s32.totalorder %s29_s15, %s609_s6  ;;  %p615_p13 = scmp.lt.s32.totalorder %s609_s6, %s609_s6 }
  0x1c   :  { %p616_p0 = por %p615_p13, %p614_p12 }
  0x1e   :  { %p617_p1 = pnand %p616_p0, %p610_p11 }
  0x20   :  { %620 = shalt.err (!%p617_p1)
}
  0x21   :  { %31 = dma.hbm_to_vmem [thread:$0]  %s722_s1, 128, %s29_s15, [#allocation8]  }
  0x22   :  { %643 = dma.done.wait [#allocation5], 128  }
  0x23   :  { %644 = vsyncadd [#allocation5], 4294967168 }
  0x24   :  { %645 = dma.done.wait [#allocation8], 128  }
  0x25   :  { %646 = vsyncadd [#allocation8], 4294967168  ;;  %vm44_vm0 = vcmask 64512   ;;  %v651_v0 = vmov 0.0   ;;  %vm652_vm1 = vmmov 0   ;;  %vm49_vm2 = vcmask 261120  }
  0x26   :  { %45 = vst.msk [vmem:[#allocation2] sm:$0xff] %vm44_vm0, %v651_v0  ;;  %542 = vmatprep.subr.mxu0 %v651_v0  ;;  %547 = vmatprep.subr.mxu1 %v651_v0  ;;  %v46_v1 = vld [vmem:[#allocation4] sm:$0xff]  ;;  %v47_v2 = vld [vmem:[#allocation7] sm:$0xff]  ;;  %v510_v34 = vstv %s723_s2  ;;  %s653_s9 = smov [#allocation9]   ;;  %vm512_vm3 = vcmask 57344  }
  0x27   :  { %544 = vmatprep.mubr.msk.f32.mxu0 %vm652_vm1, %v651_v0  ;;  %549 = vmatprep.mubr.msk.f32.mxu1 %vm652_vm1, %v651_v0  ;;  %v54_v3 = vsel %vm49_vm2, %v46_v1, 0  ;;  %v51_v4 = vsel %vm49_vm2, %v47_v2, 0  ;;  %s520_s10 = sshll.u32 %s653_s9, 4  ;;  %s521_s10 = int_to_ptr.vmem [resolvable:$true] %s520_s10 }
  0x28   :  { %v57_v5 = vand.u32 4294901760, %v54_v3  ;;  %v122_v6 = vand.u32 4294901760, %v51_v4  ;;  %s621_s11 = scalar_lea.vmem %s521_s10, 16  ;;  %s625_s12 = scalar_lea.vmem %s521_s10, 32 }
  0x29   :  { %p622_p2 = scmp.ne.s32.totalorder %s521_s10, %s621_s11  ;;  %p626_p3 = scmp.lt.s32.totalorder %s521_s10, %s521_s10 }
  0x2a   :  { %543 = vmatpush3.xpose.msra.mxu0 %v57_v5  ;;  %v134_v7 = vsub.f32 %v54_v3, %v57_v5  ;;  %v123_v8 = vsub.f32 %v51_v4, %v122_v6  ;;  %p627_p4 = scmp.lt.s32.totalorder %s625_s12, %s621_s11 }
  0x2b   :  { %552 = vmatprep.subr.mxu0 %v651_v0 }
  0x2c   :  { %v135_v9 = vand.u32 4294901760, %v134_v7  ;;  %v124_v10 = vand.u32 4294901760, %v123_v8  ;;  %p628_p5 = por %p627_p4, %p626_p3 }
  0x2d   :  { %v48_v29 = vld [vmem:[#allocation2] sm:$0xff] }
  0x2e   :  { %v136_v11 = vsub.f32 %v134_v7, %v135_v9  ;;  %v125_v12 = vsub.f32 %v123_v8, %v124_v10  ;;  %p629_p6 = pnand %p628_p5, %p622_p2 }
  0x30   :  { %v137_v13 = vand.u32 4294901760, %v136_v11  ;;  %v126_v14 = vand.u32 4294901760, %v125_v12 }
  0x32   :  { %548 = vmatpush3.xpose.msra.mxu1 %v137_v13  ;;  %545 = vmatmul.mubr.f32.vlgmr.msra.gmra.mrb[0].mxu0 %v126_v14 }
  0x33   :  { %553 = vmatpush3.xpose.msra.mxu0 %v134_v7  ;;  %557 = vmatprep.subr.mxu1 %v651_v0 }
  0x34   :  { %554 = vmatprep.mubr.msk.f32.mxu0 %vm652_vm1, %v651_v0  ;;  %562 = vmatprep.subr.mxu0 %v651_v0 }
  0x35   :  { %550 = vmatmul.mubr.f32.vlgmr.msra.gmra.mrb[0].mxu1 %v122_v6 }
  0x36   :  { %558 = vmatpush3.xpose.msra.mxu1 %v57_v5  ;;  %555 = vmatmul.mubr.f32.vlgmr.msra.gmra.mrb[2].mxu0 %v123_v8 }
  0x37   :  { %559 = vmatprep.mubr.msk.f32.mxu1 %vm652_vm1, %v651_v0  ;;  %563 = vmatpush3.xpose.msra.mxu0 %v135_v9 }
  0x38   :  { %567 = vmatprep.subr.mxu1 %v651_v0  ;;  %564 = vmatprep.mubr.msk.f32.mxu0 %vm652_vm1, %v651_v0 }
  0x39   :  { %560 = vmatmul.mubr.f32.vlgmr.msra.gmra.mrb[2].mxu1 %v124_v10 }
  0x3a   :  { %568 = vmatpush3.xpose.msra.mxu1 %v57_v5  ;;  %565 = vmatmul.mubr.f32.vlgmr.msra.gmra.mrb[4].mxu0 %v122_v6 }
  0x3b   :  { %569 = vmatprep.mubr.msk.f32.mxu1 %vm652_vm1, %v651_v0 }
  0x3d   :  { %570 = vmatmul.mubr.f32.vlgmr.msra.gmra.mrb[4].mxu1 %v122_v6 }
 0x105   :  { %v128_v15 = vpop.f32.mrb[0].mxu0 }
 0x106   :  { %v546_v16 = vpop.f32.mrb[1].mxu0 }
 0x108   :  { %v204_v17 = vpop.f32.mrb[0].mxu1 }
 0x109   :  { %v205_v18 = vadd.f32 %v204_v17, %v128_v15  ;;  %v551_v19 = vpop.f32.mrb[1].mxu1  ;;  %v278_v20 = vpop.f32.mrb[2].mxu0 }
 0x10a   :  { %v556_v21 = vpop.f32.mrb[3].mxu0 }
 0x10b   :  { %v279_v22 = vadd.f32 %v278_v20, %v205_v18 }
 0x10c   :  { %v352_v23 = vpop.f32.mrb[2].mxu1 }
 0x10d   :  { %v353_v24 = vadd.f32 %v352_v23, %v279_v22  ;;  %v561_v25 = vpop.f32.mrb[3].mxu1  ;;  %v426_v26 = vpop.f32.mrb[4].mxu0 }
 0x10e   :  { %v566_v27 = vpop.f32.mrb[5].mxu0 }
 0x10f   :  { %v427_v28 = vadd.f32 %v426_v26, %v353_v24 }
 0x110   :  { %v498_v30 = vpop.f32.mrb[4].mxu1 }
 0x111   :  { %v499_v31 = vadd.f32 %v498_v30, %v427_v28  ;;  %v571_v32 = vpop.f32.mrb[5].mxu1 }
 0x113   :  { %v502_v33 = vadd.f32 %v499_v31, %v48_v29 }
 0x115   :  { %504 = vst.msk [vmem:[#allocation2] sm:$0xff] %vm44_vm0, %v502_v33 }
 0x11c   :  { %v508_v35 = vld [vmem:[#allocation2] sm:$0x1] }
 0x11d   :  { %v511_v36 = vadd.f32 %v510_v34, %v508_v35 }
 0x11f   :  { %513 = vst.msk [vmem:[#allocation9] sm:$0x1] %vm512_vm3, %v511_v36 }
 0x120   :  { %632 = shalt.err (!%p629_p6)
}
 0x121   :  { %s633_s15 = scalar_lea.hbm %s724_s3, 16 }
 0x122   :  { %p634_p7 = scmp.ne.s32.totalorder %s724_s3, %s633_s15  ;;  %p637_p8 = scmp.lt.u32.totalorder %s633_s15, %s724_s3 }
 0x124   :  { %p639_p9 = pnand %p637_p8, %p634_p7 }
 0x126   :  { %642 = shalt.err (!%p639_p9)
}
 0x127   :  { %523 = dma.vmem_to_hbm [thread:$0]  %s521_s10, 16, %s724_s3, [#allocation6]  }
 0x128   :  { %647 = dma.done.wait [#allocation6], 16  }
 0x129   :  { %648 = vsyncadd [#allocation6], 4294967280 }
 0x12a   :  { %527 = vsyncpa [#allocation5], 1 }
 0x12b   :  { %528 = vsyncpa [#allocation8], 1 }
 0x12c   :  { %529 = vsyncpa [#allocation6], 1 }

</bundles_post_ra>
